<compile_context>
chip_gen: v7x
topology: tpu7x:2x2x1
jax: 0.10.0
libtpu: 0.0.40
codegen_flags: <defaults>
</compile_context>

<pallas_src>
import jax
import jax.numpy as jnp
from jax.experimental import pallas as pl
from jax.experimental.pallas import tpu as pltpu

DA = 350   # hidden size of first attention layer (d_a)
R = 30     # number of attention rows / heads (r)


def _round_up(x, m):
    return (x + m - 1) // m * m


def _choose_block_batch(B, S, max_rows=2048, max_bb=64):
    """How many batch elements to process per grid step.

    Constraints:
      * BB must divide B (simple index maps, no ragged edge blocks).
      * The input block is (S, BB, H); its second-to-last dim (BB) must be a
        multiple of 8 or equal to the full batch B (TPU (8,128) tiling rule).
      * Bound BB*S so the f32 hidden intermediate (BB*S, DA_PAD) stays small
        relative to VMEM (v7x: 64 MiB physical / 32 MiB scoped default).
      * Prefer >= 2 grid steps so megacore / v7x dual-TC can split the batch.
    """
    cands = [bb for bb in range(8, B, 8) if B % bb == 0]
    good = [bb for bb in cands
            if bb * S <= max_rows and bb <= max_bb and B // bb >= 2]
    if good:
        return max(good)
    if B * S <= max_rows:
        return B        # whole batch in one step (block dims == array dims)
    return min(cands) if cands else B


def _attention_kernel(x_ref, w1_ref, b1_ref, w2_ref, b2_ref, o_ref):
    # x_ref : (S, BB, H)          input block in native (seq, batch, hid) layout
    # w1_ref: (H, DA_PAD)  bf16   b1_ref: (1, DA_PAD) f32
    # w2_ref: (DA_PAD, R_PAD) bf16  b2_ref: (1, R_PAD) f32
    # o_ref : (BB, R, S)
    S, BB, H = x_ref.shape
    r_pad = w2_ref.shape[1]
    r_valid = o_ref.shape[1]

    # Flatten (S, BB) -> rows so both matmuls see an M = S*BB slab.
    # (bf16 operands, f32 accumulation on the MXU.)
    x = x_ref[...].reshape(S * BB, H).astype(jnp.bfloat16)

    # h = tanh(x @ W1 + b1)        (MXU matmul; tanh on the EUP)
    h = jnp.dot(x, w1_ref[...], preferred_element_type=jnp.float32)
    h = jnp.tanh(h + b1_ref[...])                        # (S*BB, DA_PAD) f32

    # s = h @ W2 + b2              (R padded to 128 lanes -> lane-aligned tile)
    s = jnp.dot(h.astype(jnp.bfloat16), w2_ref[...],
                preferred_element_type=jnp.float32)
    s = s + b2_ref[...]                                  # (S*BB, R_PAD) f32

    # Numerically-stable softmax over the sequence axis, per (batch, head).
    s = s.reshape(S, BB, r_pad)                          # (S, BB, R_PAD)
    m = jnp.max(s, axis=0, keepdims=True)
    e = jnp.exp(s - m)
    denom = jnp.sum(e, axis=0, keepdims=True)
    a = e * pl.reciprocal(denom, approx=True)            # (S, BB, R_PAD)

    # Epilogue: (S, R_PAD) -> (R, S) per batch element (2-D XLU transpose),
    # dropping the zero-padded heads.  BB is small and static -> unrolled.
    for b in range(BB):
        o_ref[b] = jnp.transpose(a[:, b, :])[:r_valid, :]


@jax.jit
def attention_forward(lstm_output, w1, b1, w2, b2):
    """lstm_output: (sent_len, batch, rnn_size) f32, as produced by the LSTM.

    w1: (rnn_size, 350), b1: (350,)   -- first Linear, stored as (in, out)
    w2: (350, 30),       b2: (30,)    -- second Linear, stored as (in, out)

    Returns the attention weight matrix of shape (batch, 30, sent_len).
    """
    S, B, H = lstm_output.shape
    da, r = w1.shape[1], w2.shape[1]
    da_pad = _round_up(da, 128)      # 350 -> 384 : lane-friendly K/N
    r_pad = _round_up(r, 128)        # 30  -> 128 : lane-dense score tile

    # Zero-pad + bf16-cast the (tiny) weights once in the wrapper.  Zero pads
    # keep the math exact: padded W1 columns give tanh(0)=0 and padded W2 rows
    # contribute nothing.  Activations are cast to bf16 inside the kernel
    # (a wrapper cast would just add an extra HBM pass).
    w1p = jnp.zeros((H, da_pad), jnp.bfloat16).at[:, :da].set(w1.astype(jnp.bfloat16))
    b1p = jnp.zeros((1, da_pad), jnp.float32).at[:, :da].set(b1.astype(jnp.float32))
    w2p = jnp.zeros((da_pad, r_pad), jnp.bfloat16).at[:da, :r].set(w2.astype(jnp.bfloat16))
    b2p = jnp.zeros((1, r_pad), jnp.float32).at[:, :r].set(b2.astype(jnp.float32))

    bb = _choose_block_batch(B, S)
    grid = (B // bb,)
    num_steps = grid[0]

    cost = pl.CostEstimate(
        flops=2 * B * S * (H * da + da * r),
        transcendentals=B * S * da + B * r * S,
        bytes_accessed=(S * B * H * 4 + B * r * S * 4
                        + num_steps * ((H * da_pad + da_pad * r_pad) * 2
                                       + (da_pad + r_pad) * 4)),
    )

    return pl.pallas_call(
        _attention_kernel,
        out_shape=jax.ShapeDtypeStruct((B, r, S), jnp.float32),
        grid_spec=pltpu.PrefetchScalarGridSpec(
            num_scalar_prefetch=0,
            grid=grid,
            in_specs=[
                # Kernel consumes lstm_output directly in (seq, batch, hid)
                # layout -- no wrapper transpose / extra HBM round trip.
                pl.BlockSpec((S, bb, H), lambda i: (0, i, 0)),
                pl.BlockSpec((H, da_pad), lambda i: (0, 0)),
                pl.BlockSpec((1, da_pad), lambda i: (0, 0)),
                pl.BlockSpec((da_pad, r_pad), lambda i: (0, 0)),
                pl.BlockSpec((1, r_pad), lambda i: (0, 0)),
            ],
            # Output last dim is sent_len; stores are unmasked whenever
            # sent_len is a multiple of 128.  For tiny S, padding S in HBM
            # would cost more traffic than the masked stores it removes, so we
            # keep the exact (B, 30, S) result.
            out_specs=pl.BlockSpec((bb, r, S), lambda i: (i, 0, 0)),
        ),
        compiler_params=pltpu.CompilerParams(
            dimension_semantics=("parallel",),
        ),
        cost_estimate=cost,
    )(lstm_output, w1p, b1p, w2p, b2p)


def _reference(lstm_output, w1, b1, w2, b2):
    x = jnp.transpose(lstm_output, (1, 0, 2)).astype(jnp.float32)
    h = jnp.tanh(x @ w1 + b1)
    s = h @ w2 + b2
    s = jnp.transpose(s, (0, 2, 1))
    return jax.nn.softmax(s, axis=2)


if __name__ == "__main__":
    rnn_size = 32     # hid_dim * num_directions
    sent_len = 8
    batch = 2

    key = jax.random.PRNGKey(0)
    k_x, k_w1, k_b1, k_w2, k_b2 = jax.random.split(key, 5)

    # Synthetic parameters (shapes from nn.Linear(rnn_size,350) and
    # nn.Linear(350,30)); stored transposed as (in, out) for x @ W.
    lstm_output = jax.random.normal(k_x, (sent_len, batch, rnn_size), jnp.float32)
    w1 = jax.random.normal(k_w1, (rnn_size, DA), jnp.float32) * 0.05
    b1 = jax.random.normal(k_b1, (DA,), jnp.float32) * 0.05
    w2 = jax.random.normal(k_w2, (DA, R), jnp.float32) * 0.05
    b2 = jax.random.normal(k_b2, (R,), jnp.float32) * 0.05

    out = attention_forward(lstm_output, w1, b1, w2, b2)
    out = jax.block_until_ready(out)

    ref = _reference(lstm_output, w1, b1, w2, b2)
    assert out.shape == (batch, R, sent_len), out.shape
    # bf16 matmul operands + approx reciprocal -> relax tolerance slightly.
    assert jnp.allclose(out, ref, atol=5e-3, rtol=0), "mismatch vs reference"

    print("KERNEL_OK")
</pallas_src>

<mosaic_0001>
module attributes {stable_mosaic.version = 11 : i64} {
  func.func @_attention_kernel(%arg0: i32, %arg1: memref<8x2x32xf32, #tpu.memory_space<vmem>>, %arg2: memref<32x384xbf16, #tpu.memory_space<vmem>>, %arg3: memref<1x384xf32, #tpu.memory_space<vmem>>, %arg4: memref<384x128xbf16, #tpu.memory_space<vmem>>, %arg5: memref<1x128xf32, #tpu.memory_space<vmem>>, %arg6: memref<2x30x8xf32, #tpu.memory_space<vmem>>) attributes {dimension_semantics = [#tpu.dimension_semantics<parallel>], iteration_bounds = array<i64: 1>, scalar_prefetch = 0 : i64, scratch_operands = 0 : i64, tpu.core_type = #tpu.core_type<tc>, window_params = [{transform_indices = @transform_0, window_bounds = array<i64: 8, 2, 32>}, {pipeline_mode = #tpu.pipeline_mode<synchronous>, transform_indices = @transform_1, window_bounds = array<i64: 32, 384>}, {pipeline_mode = #tpu.pipeline_mode<synchronous>, transform_indices = @transform_2, window_bounds = array<i64: 1, 384>}, {pipeline_mode = #tpu.pipeline_mode<synchronous>, transform_indices = @transform_3, window_bounds = array<i64: 384, 128>}, {pipeline_mode = #tpu.pipeline_mode<synchronous>, transform_indices = @transform_4, window_bounds = array<i64: 1, 128>}, {transform_indices = @transform_5, window_bounds = array<i64: 2, 30, 8>}]} {
    %c0 = arith.constant 0 : index
    %c0_0 = arith.constant 0 : index
    %c0_1 = arith.constant 0 : index
    %0 = vector.load %arg1[%c0, %c0_0, %c0_1] : memref<8x2x32xf32, #tpu.memory_space<vmem>>, vector<8x2x32xf32>
    %1 = vector.shape_cast %0 : vector<8x2x32xf32> to vector<16x32xf32>
    %2 = arith.truncf %1 : vector<16x32xf32> to vector<16x32xbf16>
    %c0_2 = arith.constant 0 : index
    %c0_3 = arith.constant 0 : index
    %3 = vector.load %arg2[%c0_2, %c0_3] : memref<32x384xbf16, #tpu.memory_space<vmem>>, vector<32x384xbf16>
    %cst = arith.constant dense<0.000000e+00> : vector<16x384xf32>
    %4 = tpu.matmul %2, %3, %cst {dimension_numbers = #tpu.dot_dimension_numbers<[1], [0], [0], [1], [0, 0, 1, 1], [], []>} : vector<16x32xbf16>, vector<32x384xbf16>, vector<16x384xf32> -> vector<16x384xf32>
    %c0_4 = arith.constant 0 : index
    %c0_5 = arith.constant 0 : index
    %5 = vector.load %arg3[%c0_4, %c0_5] : memref<1x384xf32, #tpu.memory_space<vmem>>, vector<1x384xf32>
    %6 = vector.broadcast %5 : vector<1x384xf32> to vector<16x384xf32>
    %7 = arith.addf %4, %6 : vector<16x384xf32>
    %8 = math.tanh %7 : vector<16x384xf32>
    %9 = arith.truncf %8 : vector<16x384xf32> to vector<16x384xbf16>
    %c0_6 = arith.constant 0 : index
    %c0_7 = arith.constant 0 : index
    %10 = vector.load %arg4[%c0_6, %c0_7] : memref<384x128xbf16, #tpu.memory_space<vmem>>, vector<384x128xbf16>
    %cst_8 = arith.constant dense<0.000000e+00> : vector<16x128xf32>
    %11 = tpu.matmul %9, %10, %cst_8 {dimension_numbers = #tpu.dot_dimension_numbers<[1], [0], [0], [1], [0, 0, 1, 1], [], []>} : vector<16x384xbf16>, vector<384x128xbf16>, vector<16x128xf32> -> vector<16x128xf32>
    %c0_9 = arith.constant 0 : index
    %c0_10 = arith.constant 0 : index
    %12 = vector.load %arg5[%c0_9, %c0_10] : memref<1x128xf32, #tpu.memory_space<vmem>>, vector<1x128xf32>
    %13 = vector.broadcast %12 : vector<1x128xf32> to vector<16x128xf32>
    %14 = arith.addf %11, %13 : vector<16x128xf32>
    %15 = vector.shape_cast %14 : vector<16x128xf32> to vector<8x2x128xf32>
    %cst_11 = arith.constant dense<0xFF800000> : vector<2x128xf32>
    %16 = vector.multi_reduction <maximumf>, %15, %cst_11 [0] : vector<8x2x128xf32> to vector<2x128xf32>
    %17 = vector.shape_cast %16 : vector<2x128xf32> to vector<1x2x128xf32>
    %18 = vector.broadcast %17 : vector<1x2x128xf32> to vector<8x2x128xf32>
    %19 = arith.subf %15, %18 : vector<8x2x128xf32>
    %20 = math.exp %19 : vector<8x2x128xf32>
    %cst_12 = arith.constant dense<0.000000e+00> : vector<2x128xf32>
    %21 = vector.multi_reduction <add>, %20, %cst_12 [0] : vector<8x2x128xf32> to vector<2x128xf32>
    %22 = vector.shape_cast %21 : vector<2x128xf32> to vector<1x2x128xf32>
    %23 = tpu.reciprocal %22 {approx = true} : vector<1x2x128xf32> -> vector<1x2x128xf32>
    %24 = vector.broadcast %23 : vector<1x2x128xf32> to vector<8x2x128xf32>
    %25 = arith.mulf %20, %24 : vector<8x2x128xf32>
    %26 = vector.extract_strided_slice %25 {offsets = [0, 0, 0], sizes = [8, 1, 128], strides = [1, 1, 1]} : vector<8x2x128xf32> to vector<8x1x128xf32>
    %27 = vector.shape_cast %26 : vector<8x1x128xf32> to vector<8x128xf32>
    %28 = tpu.transpose %27, [1, 0] : vector<8x128xf32> -> vector<128x8xf32>
    %29 = vector.extract_strided_slice %28 {offsets = [0, 0], sizes = [30, 8], strides = [1, 1]} : vector<128x8xf32> to vector<30x8xf32>
    %c0_13 = arith.constant 0 : index
    %c0_14 = arith.constant 0 : index
    %c0_15 = arith.constant 0 : index
    %30 = vector.load %arg6[%c0_13, %c0_14, %c0_15] : memref<2x30x8xf32, #tpu.memory_space<vmem>>, vector<1x30x8xf32>
    %31 = vector.shape_cast %30 : vector<1x30x8xf32> to vector<30x8xf32>
    %32 = vector.shape_cast %29 : vector<30x8xf32> to vector<1x30x8xf32>
    tpu.vector_store %arg6[%c0_13, %c0_14, %c0_15], %32 {strides = array<i32>} : memref<2x30x8xf32, #tpu.memory_space<vmem>>, vector<1x30x8xf32>,
    %33 = vector.extract_strided_slice %25 {offsets = [0, 1, 0], sizes = [8, 1, 128], strides = [1, 1, 1]} : vector<8x2x128xf32> to vector<8x1x128xf32>
    %34 = vector.shape_cast %33 : vector<8x1x128xf32> to vector<8x128xf32>
    %35 = tpu.transpose %34, [1, 0] : vector<8x128xf32> -> vector<128x8xf32>
    %36 = vector.extract_strided_slice %35 {offsets = [0, 0], sizes = [30, 8], strides = [1, 1]} : vector<128x8xf32> to vector<30x8xf32>
    %c1 = arith.constant 1 : index
    %c0_16 = arith.constant 0 : index
    %c0_17 = arith.constant 0 : index
    %37 = vector.load %arg6[%c1, %c0_16, %c0_17] : memref<2x30x8xf32, #tpu.memory_space<vmem>>, vector<1x30x8xf32>
    %38 = vector.shape_cast %37 : vector<1x30x8xf32> to vector<30x8xf32>
    %39 = vector.shape_cast %36 : vector<30x8xf32> to vector<1x30x8xf32>
    tpu.vector_store %arg6[%c1, %c0_16, %c0_17], %39 {strides = array<i32>} : memref<2x30x8xf32, #tpu.memory_space<vmem>>, vector<1x30x8xf32>,
    return
  }
  func.func @transform_0(%arg0: i32) -> (i32, i32, i32) {
    %c0_i32 = arith.constant 0 : i32
    %c0_i32_0 = arith.constant 0 : i32
    %c0_i32_1 = arith.constant 0 : i32
    return %c0_i32, %arg0, %c0_i32_0 : i32, i32, i32
  }
  func.func @transform_1(%arg0: i32) -> (i32, i32) {
    %c0_i32 = arith.constant 0 : i32
    %c0_i32_0 = arith.constant 0 : i32
    %c0_i32_1 = arith.constant 0 : i32
    return %c0_i32, %c0_i32_0 : i32, i32
  }
  func.func @transform_2(%arg0: i32) -> (i32, i32) {
    %c0_i32 = arith.constant 0 : i32
    %c0_i32_0 = arith.constant 0 : i32
    %c0_i32_1 = arith.constant 0 : i32
    return %c0_i32, %c0_i32_0 : i32, i32
  }
  func.func @transform_3(%arg0: i32) -> (i32, i32) {
    %c0_i32 = arith.constant 0 : i32
    %c0_i32_0 = arith.constant 0 : i32
    %c0_i32_1 = arith.constant 0 : i32
    return %c0_i32, %c0_i32_0 : i32, i32
  }
  func.func @transform_4(%arg0: i32) -> (i32, i32) {
    %c0_i32 = arith.constant 0 : i32
    %c0_i32_0 = arith.constant 0 : i32
    %c0_i32_1 = arith.constant 0 : i32
    return %c0_i32, %c0_i32_0 : i32, i32
  }
  func.func @transform_5(%arg0: i32) -> (i32, i32, i32) {
    %c0_i32 = arith.constant 0 : i32
    %c0_i32_0 = arith.constant 0 : i32
    %c0_i32_1 = arith.constant 0 : i32
    return %arg0, %c0_i32, %c0_i32_0 : i32, i32, i32
  }
}

</mosaic_0001>

<bundles_post_ra>
// kernel: attention_forward.1
= control target key start
LH: loop header
LB: loop body
LE: loop exit
PB: predicated region body
PF: predicated region fallthrough
CT: control target
= control target key end

     0   :  { %v42_v0 = vlaneseq  ;;  %v956_v2 = vmov 0.0   ;;  %v957_v3 = vmov 0   ;;  %v958_v4 = vmov 1983009808   ;;  %s1216_s1 = inlined_call_operand.vmem [shape: bf16[32,384], index: 1, kind: input, shape index: {}]   ;;  %s1217_s0 = inlined_call_operand.vmem [shape: f32[8,2,32], index: 0, kind: input, shape index: {}]   ;;  %s1218_s3 = inlined_call_operand.vmem [shape: bf16[384,128], index: 3, kind: input, shape index: {}]   ;;  %s1219_s2 = inlined_call_operand.vmem [shape: f32[1,384], index: 2, kind: input, shape index: {}]   ;;  %s1220_s4 = inlined_call_operand.vmem [shape: f32[1,128], index: 4, kind: input, shape index: {}]   ;;  %s1221_s5 = inlined_call_operand.vmem [shape: f32[2,30,8], index: 5, kind: output, shape index: {}]  }
   0x1   :  { %v894_v1 = vld [vmem:[%s1216_s1 + $0x4] ss:$12 sps:$4 sm:$0xff]   ;;  %862 = vmatprep.subr.bf16.mxu1 %v956_v2  ;;  %167 = vmatprep.mubr.bf16.mxu0 %v957_v3  ;;  %v40_v5 = vunpack.c.l.s4 %v958_v4  ;;  %v896_v6 = vld [vmem:[%s1216_s1] ss:$12 sps:$4 sm:$0xff]   ;;  %vm959_vm0 = vmmov 0   ;;  %vm131_vm1 = vcmask 261120  }
   0x2   :  { %866 = vmatprep.mubr.msk.bf16.mxu1 %vm959_vm0, %v956_v2  ;;  %135 = vmatprep.subr.bf16.mxu0 %v894_v1  ;;  %v897_v7 = vld [vmem:[%s1216_s1 + $0x8] ss:$12 sps:$4 sm:$0xff]   ;;  %v1002_v9 = vshrl.u32 %v42_v0, 7  ;;  %v900_v11 = vld [vmem:[%s1216_s1 + $0x18] ss:$12 sps:$4 sm:$0xff]   ;;  %vm553_vm2 = vcmask 1041408  }
   0x3   :  { %v41_v8 = vunpack.c.0.s8 %v40_v5  ;;  %136 = vmatpush1.bf16.msra.mxu0 %v896_v6  ;;  %v898_v10 = vld [vmem:[%s1216_s1 + $0x1c] ss:$12 sps:$4 sm:$0xff]   ;;  %863 = vmatpush3.bf16.msra.mxu1 %v897_v7  ;;  %v901_v12 = vld [vmem:[%s1216_s1 + $0x20] ss:$12 sps:$4 sm:$0xff]   ;;  %v23_v16 = vld [vmem:[%s1217_s0 + $0x4] sm:$0x3] }
   0x4   :  { %v21_v13 = vld [vmem:[%s1217_s0] sm:$0x3]  ;;  %137 = vmatprep.subr.bf16.mxu0 %v898_v10  ;;  %864 = vmatprep.subr.bf16.mxu1 %v956_v2  ;;  %v22_v15 = vld [vmem:[%s1217_s0 + $0x2] sm:$0x3]  ;;  %v24_v17 = vld [vmem:[%s1217_s0 + $0x6] sm:$0x3] }
   0x5   :  { %v1017_v14 = vsub.s32 %v41_v8, %v1002_v9  ;;  %v25_v18 = vld [vmem:[%s1217_s0 + $0x8] sm:$0x3]  ;;  %v26_v19 = vld [vmem:[%s1217_s0 + $0xa] sm:$0x3]  ;;  %v27_v20 = vld [vmem:[%s1217_s0 + $0xc] sm:$0x3]  ;;  %v37_v21 = vcombine.low %v21_v13, %v22_v15  ;;  %v38_v22 = vcombine.low %v23_v16, %v24_v17 }
   0x6   :  { %v28_v23 = vld [vmem:[%s1217_s0 + $0xe] sm:$0x3]  ;;  %v54_v24 = vcombine.low %v25_v18, %v26_v19  ;;  %v902_v28 = vld [vmem:[%s1218_s3 + $0x40] sm:$0xff]   ;;  %v908_v39 = vld [vmem:[%s1218_s3 + $0x50] sm:$0xff]   ;;  %v1128_v57 = vsub.s32 0, %v1002_v9  ;;  %v1134_v59 = vsub.s32 1, %v1002_v9 }
   0x7   :  { %138 = vmatpush1.bf16.msra.mxu0 %v900_v11  ;;  %865 = vmatpush3.bf16.msra.mxu1 %v901_v12  ;;  %v45_v25 = vrot.slane %v37_v21, %v1017_v14  ;;  %v52_v26 = vrot.slane %v38_v22, %v1017_v14  ;;  %v55_v27 = vcombine.low %v27_v20, %v28_v23  ;;  %v903_v33 = vld [vmem:[%s1218_s3] sm:$0xff]   ;;  %v905_v36 = vld [vmem:[%s1218_s3 + $0x48] sm:$0xff]   ;;  %v909_v40 = vld [vmem:[%s1218_s3 + $0x10] sm:$0xff]   ;;  %v94_v60 = vsub.s32 2, %v1002_v9 }
   0x8   :  { %v62_v29 = vrot.slane %v54_v24, %v1017_v14  ;;  %870 = vmatprep.subr.bf16.mxu1 %v956_v2  ;;  %831 = vmatprep.subr.bf16.mxu0 %v902_v28  ;;  %v904_v34 = vld [vmem:[%s1218_s3 + $0x80] sm:$0xff]   ;;  %v906_v37 = vld [vmem:[%s1218_s3 + $0x8] sm:$0xff]   ;;  %v910_v41 = vld [vmem:[%s1218_s3 + $0x90] sm:$0xff]   ;;  %vm657_vm3 = vcmask 1041409   ;;  %vm659_vm4 = vcmask 1042434   ;;  %vm661_vm5 = vcmask 1043459  }
   0x9   :  { %v53_v30 = vcombine.low %v45_v25, %v52_v26  ;;  %v69_v31 = vrot.slane %v55_v27, %v1017_v14  ;;  %v907_v38 = vld [vmem:[%s1218_s3 + $0x88] sm:$0xff]   ;;  %v911_v42 = vld [vmem:[%s1218_s3 + $0x58] sm:$0xff]   ;;  %v914_v45 = vld [vmem:[%s1218_s3 + $0x60] sm:$0xff]   ;;  %vm663_vm6 = vcmask 1044484   ;;  %vm665_vm7 = vcmask 1045509  }
   0xa   :  { %v912_v43 = vld [vmem:[%s1218_s3 + $0x18] sm:$0xff]   ;;  %v915_v46 = vld [vmem:[%s1218_s3 + $0x20] sm:$0xff]   ;;  %v917_v48 = vld [vmem:[%s1218_s3 + $0x68] sm:$0xff]   ;;  %vm667_vm8 = vcmask 1046534   ;;  %vm669_vm9 = vcmask 1047559   ;;  %vm704_vm10 = vcmask 64512  }
   0xb   :  { %v70_v32 = vcombine.low %v62_v29, %v69_v31  ;;  %v913_v44 = vld [vmem:[%s1218_s3 + $0x98] sm:$0xff]   ;;  %v916_v47 = vld [vmem:[%s1218_s3 + $0xa0] sm:$0xff]   ;;  %v918_v49 = vld [vmem:[%s1218_s3 + $0x28] sm:$0xff]   ;;  %vm708_vm11 = vcmask 62464  }
   0xc   :  { %v919_v50 = vld [vmem:[%s1218_s3 + $0xa8] sm:$0xff]   ;;  %v920_v51 = vld [vmem:[%s1218_s3 + $0x70] sm:$0xff]   ;;  %v923_v54 = vld [vmem:[%s1218_s3 + $0x78] sm:$0xff]  }
   0xd   :  { %v73_v35 = vpack.c.bf16 %v70_v32, %v53_v30  ;;  %v921_v52 = vld [vmem:[%s1218_s3 + $0x30] sm:$0xff]   ;;  %v924_v55 = vld [vmem:[%s1218_s3 + $0x38] sm:$0xff]   ;;  %v82_v58 = vld [vmem:[%s1219_s2] sm:$0x7] }
   0xe   :  { %v922_v53 = vld [vmem:[%s1218_s3 + $0xb0] sm:$0xff]   ;;  %v925_v56 = vld [vmem:[%s1218_s3 + $0xb8] sm:$0xff]   ;;  %v87_v61 = vrot.slane %v82_v58, %v1128_v57  ;;  %v91_v62 = vrot.slane %v82_v58, %v1134_v59  ;;  %v95_v63 = vrot.slane %v82_v58, %v94_v60  ;;  %v799_v26 = vld [vmem:[%s1220_s4] ss:$0 sm:$0xff] }
   0xf   :  { %797 = vmatmul.mubr.msk.bf16.vlgmr.msra.gmra.mrb[0].mxu0 %vm131_vm1, %v73_v35  ;;  %867 = vmatmul.mubr.msk.bf16.vlgmr.msra.gmra.mrb[0].mxu1 %vm131_vm1, %v73_v35 }
  0x10   :  { %832 = vmatpush3.bf16.msra.mxu0 %v903_v33  ;;  %871 = vmatpush3.bf16.msra.mxu1 %v904_v34 }
  0x11   :  { %833 = vmatprep.subr.bf16.mxu0 %v905_v36  ;;  %872 = vmatprep.subr.bf16.mxu1 %v956_v2 }
  0x12   :  { %886 = vmatprep.mubr.msk.bf16.mxu1 %vm959_vm0, %v956_v2 }
  0x14   :  { %834 = vmatpush3.bf16.msra.mxu0 %v906_v37  ;;  %873 = vmatpush3.bf16.msra.mxu1 %v907_v38 }
  0x15   :  { %835 = vmatprep.subr.bf16.mxu0 %v908_v39  ;;  %874 = vmatprep.subr.bf16.mxu1 %v956_v2 }
  0x18   :  { %836 = vmatpush3.bf16.msra.mxu0 %v909_v40  ;;  %875 = vmatpush3.bf16.msra.mxu1 %v910_v41 }
  0x19   :  { %876 = vmatprep.subr.bf16.mxu1 %v956_v2  ;;  %837 = vmatprep.subr.bf16.mxu0 %v911_v42 }
  0x1c   :  { %838 = vmatpush3.bf16.msra.mxu0 %v912_v43  ;;  %877 = vmatpush3.bf16.msra.mxu1 %v913_v44 }
  0x1d   :  { %878 = vmatprep.subr.bf16.mxu1 %v956_v2  ;;  %839 = vmatprep.subr.bf16.mxu0 %v914_v45 }
  0x20   :  { %840 = vmatpush3.bf16.msra.mxu0 %v915_v46  ;;  %879 = vmatpush3.bf16.msra.mxu1 %v916_v47 }
  0x21   :  { %880 = vmatprep.subr.bf16.mxu1 %v956_v2  ;;  %841 = vmatprep.subr.bf16.mxu0 %v917_v48 }
  0x24   :  { %842 = vmatpush3.bf16.msra.mxu0 %v918_v49  ;;  %881 = vmatpush3.bf16.msra.mxu1 %v919_v50 }
  0x25   :  { %843 = vmatprep.subr.bf16.mxu0 %v920_v51  ;;  %882 = vmatprep.subr.bf16.mxu1 %v956_v2 }
  0x28   :  { %844 = vmatpush3.bf16.msra.mxu0 %v921_v52  ;;  %883 = vmatpush3.bf16.msra.mxu1 %v922_v53 }
  0x29   :  { %845 = vmatprep.subr.bf16.mxu0 %v923_v54  ;;  %884 = vmatprep.subr.bf16.mxu1 %v956_v2 }
  0x2c   :  { %846 = vmatpush3.bf16.msra.mxu0 %v924_v55  ;;  %885 = vmatpush3.bf16.msra.mxu1 %v925_v56 }
  0xe2   :  { %v169_v0 = vpop.f32.mrb[0].mxu0  ;;  %v212_v1 = vpop.f32.mrb[0].mxu1 }
  0xe3   :  { %v170_v2 = vadd.f32 %v169_v0, %v87_v61  ;;  %v171_v3 = vpop.f32.mrb[1].mxu0  ;;  %v868_v4 = vpop.f32.mrb[1].mxu1  ;;  %v213_v7 = vadd.f32 %v212_v1, %v95_v63 }
  0xe4   :  { %v172_v5 = vadd.f32 %v171_v3, %v91_v62  ;;  %v173_v6 = vpop.f32.mrb[2].mxu0  ;;  %v215_v8 = vpop.f32.mrb[2].mxu1 }
  0xe5   :  { %926 = vtanh.f32 %v170_v2  ;;  %v174_v10 = vadd.f32 %v173_v6, %v87_v61  ;;  %v175_v11 = vpop.f32.mrb[3].mxu0  ;;  %v869_v12 = vpop.f32.mrb[3].mxu1  ;;  %v216_v13 = vadd.f32 %v215_v8, %v95_v63 }
  0xe6   :  { %928 = vtanh.f32 %v172_v5  ;;  %v176_v9 = vadd.f32 %v175_v11, %v91_v62 }
  0xe7   :  { %930 = vtanh.f32 %v174_v10 }
  0xe8   :  { %932 = vtanh.f32 %v213_v7 }
  0xe9   :  { %934 = vtanh.f32 %v176_v9 }
  0xea   :  { %936 = vtanh.f32 %v216_v13 }
  0xef   :  { %v927_v15 = vpop.eup %926 }
  0xf0   :  { %v929_v16 = vpop.eup %928 }
  0xf1   :  { %v931_v17 = vpop.eup %930 }
  0xf2   :  { %v933_v18 = vpop.eup %932  ;;  %v225_v19 = vpack.c.bf16 %v931_v17, %v927_v15 }
  0xf3   :  { %v935_v20 = vpop.eup %934 }
  0xf4   :  { %v937_v21 = vpop.eup %936  ;;  %v226_v22 = vpack.c.bf16 %v935_v20, %v929_v16 }
  0xf5   :  { %v227_v23 = vpack.c.bf16 %v937_v21, %v933_v18 }
  0xf6   :  { %459 = vmatprep.mubr.bf16.mxu0 %v226_v22 }
  0xf7   :  { %460 = vmatmul.mubr.bf16.vlgmr.msra.gmra.mrb[4].mxu0 %v225_v19  ;;  %887 = vmatmul.mubr.bf16.vlgmr.msra.gmra.mrb[4].mxu1 %v227_v23 }
 0x1ca   :  { %v847_v24 = vpop.f32.mrb[4].mxu0  ;;  %v502_v25 = vpop.f32.mrb[4].mxu1 }
 0x1cb   :  { %v848_v27 = vpop.f32.mrb[5].mxu0  ;;  %v888_v28 = vpop.f32.mrb[5].mxu1 }
 0x1cc   :  { %v849_v29 = vadd.f32 %v848_v27, %v847_v24  ;;  %v850_v30 = vpop.f32.mrb[6].mxu0  ;;  %v505_v31 = vpop.f32.mrb[6].mxu1 }
 0x1cd   :  { %v851_v32 = vpop.f32.mrb[7].mxu0  ;;  %v889_v33 = vpop.f32.mrb[7].mxu1 }
 0x1ce   :  { %v462_v34 = vadd.f32 %v849_v29, %v799_v26  ;;  %v852_v35 = vadd.f32 %v851_v32, %v850_v30 }
 0x1d0   :  { %v503_v36 = vadd.f32 %v502_v25, %v462_v34  ;;  %v465_v37 = vadd.f32 %v852_v35, %v799_v26 }
 0x1d2   :  { %v511_v38 = vcombine.high %v503_v36, %v503_v36  ;;  %v518_v39 = vrot.slane %v503_v36, %v1017_v14  ;;  %v506_v40 = vadd.f32 %v505_v31, %v465_v37 }
 0x1d4   :  { %v525_v41 = vrot.slane %v511_v38, %v1017_v14  ;;  %v528_v42 = vcombine.high %v506_v40, %v506_v40  ;;  %v526_v43 = vcombine.high %v518_v39, %v518_v39  ;;  %v535_v44 = vrot.slane %v506_v40, %v1017_v14 }
 0x1d5   :  { %v554_v47 = vsel %vm553_vm2, %v518_v39, -inf }
 0x1d6   :  { %v527_v45 = vcombine.high %v525_v41, %v525_v41  ;;  %v542_v46 = vrot.slane %v528_v42, %v1017_v14  ;;  %v543_v48 = vcombine.high %v535_v44, %v535_v44  ;;  %v558_v49 = vsel %vm553_vm2, %v535_v44, -inf }
 0x1d7   :  { %v556_v50 = vsel %vm553_vm2, %v525_v41, -inf  ;;  %v559_v52 = vmax.f32 %v554_v47, %v558_v49  ;;  %v555_v54 = vsel %vm553_vm2, %v526_v43, -inf }
 0x1d8   :  { %v544_v51 = vcombine.high %v542_v46, %v542_v46  ;;  %v562_v53 = vsel %vm553_vm2, %v542_v46, -inf  ;;  %v560_v55 = vsel %vm553_vm2, %v543_v48, -inf  ;;  %v557_v58 = vsel %vm553_vm2, %v527_v45, -inf }
 0x1d9   :  { %v563_v56 = vmax.f32 %v556_v50, %v562_v53  ;;  %v561_v60 = vmax.f32 %v555_v54, %v560_v55 }
 0x1da   :  { %v564_v14 = vsel %vm553_vm2, %v544_v51, -inf }
 0x1db   :  { %v565_v61 = vmax.f32 %v557_v58, %v564_v14  ;;  %v566_v62 = vmax.f32 %v559_v52, %v561_v60 }
 0x1dd   :  { %v567_v63 = vmax.f32 %v563_v56, %v565_v61 }
 0x1df   :  { %v568_v0 = vmax.f32 %v566_v62, %v567_v63 }
 0x1e1   :  { %v569_v1 = vsub.f32 %v518_v39, %v568_v0  ;;  %v570_v2 = vsub.f32 %v526_v43, %v568_v0  ;;  %v571_v3 = vsub.f32 %v525_v41, %v568_v0  ;;  %v572_v4 = vsub.f32 %v527_v45, %v568_v0 }
 0x1e2   :  { %v573_v5 = vsub.f32 %v535_v44, %v568_v0  ;;  %v574_v6 = vsub.f32 %v543_v48, %v568_v0  ;;  %v575_v7 = vsub.f32 %v542_v46, %v568_v0  ;;  %v576_v8 = vsub.f32 %v544_v51, %v568_v0 }
 0x1e3   :  { %v577_v10 = vmul.f32 1.442695, %v569_v1  ;;  %v579_v11 = vmul.f32 1.442695, %v570_v2  ;;  %v581_v12 = vmul.f32 1.442695, %v571_v3 }
 0x1e4   :  { %v583_v9 = vmul.f32 1.442695, %v572_v4  ;;  %v585_v13 = vmul.f32 1.442695, %v573_v5  ;;  %v587_v15 = vmul.f32 1.442695, %v574_v6 }
 0x1e5   :  { %938 = vpow2.f32 %v577_v10  ;;  %v589_v16 = vmul.f32 1.442695, %v575_v7  ;;  %v591_v17 = vmul.f32 1.442695, %v576_v8 }
 0x1e6   :  { %940 = vpow2.f32 %v579_v11 }
 0x1e7   :  { %942 = vpow2.f32 %v581_v12 }
 0x1e8   :  { %944 = vpow2.f32 %v583_v9 }
 0x1e9   :  { %946 = vpow2.f32 %v585_v13 }
 0x1ea   :  { %948 = vpow2.f32 %v587_v15 }
 0x1eb   :  { %950 = vpow2.f32 %v589_v16 }
 0x1ec   :  { %952 = vpow2.f32 %v591_v17 }
 0x1ef   :  { %v939_v18 = vpop.eup %938 }
 0x1f0   :  { %v941_v19 = vpop.eup %940  ;;  %v593_v20 = vsel %vm553_vm2, %v939_v18, 0.0 }
 0x1f1   :  { %v943_v21 = vpop.eup %942  ;;  %v594_v22 = vsel %vm553_vm2, %v941_v19, 0.0 }
 0x1f2   :  { %v945_v23 = vpop.eup %944  ;;  %v595_v24 = vadd.f32 %v594_v22, %v593_v20  ;;  %v596_v25 = vsel %vm553_vm2, %v943_v21, 0.0 }
 0x1f3   :  { %v947_v26 = vpop.eup %946  ;;  %v598_v28 = vsel %vm553_vm2, %v945_v23, 0.0 }
 0x1f4   :  { %v597_v27 = vadd.f32 %v596_v25, %v595_v24  ;;  %v949_v29 = vpop.eup %948  ;;  %v600_v31 = vsel %vm553_vm2, %v947_v26, 0.0 }
 0x1f5   :  { %v951_v32 = vpop.eup %950  ;;  %v602_v34 = vsel %vm553_vm2, %v949_v29, 0.0 }
 0x1f6   :  { %v599_v30 = vadd.f32 %v598_v28, %v597_v27  ;;  %v953_v35 = vpop.eup %952  ;;  %v604_v37 = vsel %vm553_vm2, %v951_v32, 0.0 }
 0x1f7   :  { %v606_v39 = vsel %vm553_vm2, %v953_v35, 0.0 }
 0x1f8   :  { %v601_v33 = vadd.f32 %v600_v31, %v599_v30 }
 0x1fa   :  { %v603_v36 = vadd.f32 %v602_v34, %v601_v33 }
 0x1fc   :  { %v605_v38 = vadd.f32 %v604_v37, %v603_v36 }
 0x1fe   :  { %v607_v40 = vadd.f32 %v606_v39, %v605_v38 }
 0x200   :  { %954 = vrcp.f32 %v607_v40 }
 0x20a   :  { %v955_v41 = vpop.eup %954 }
 0x20b   :  { %v609_v42 = vmul.f32 %v955_v41, %v939_v18  ;;  %v610_v43 = vmul.f32 %v955_v41, %v941_v19  ;;  %v611_v44 = vmul.f32 %v955_v41, %v943_v21  ;;  %v612_v45 = vmul.f32 %v955_v41, %v945_v23 }
 0x20c   :  { %v613_v46 = vmul.f32 %v955_v41, %v947_v26  ;;  %v614_v47 = vmul.f32 %v955_v41, %v949_v29  ;;  %v615_v48 = vmul.f32 %v955_v41, %v951_v32  ;;  %v616_v49 = vmul.f32 %v955_v41, %v953_v35 }
 0x20d   :  { %v628_v50 = vrot.slane %v609_v42, %v1128_v57  ;;  %v632_v51 = vrot.slane %v610_v43, %v1128_v57  ;;  %v636_v52 = vrot.slane %v611_v44, %v1128_v57  ;;  %v640_v53 = vrot.slane %v612_v45, %v1128_v57 }
 0x20e   :  { %v713_v55 = vrot.slane %v609_v42, %v1134_v59  ;;  %v717_v56 = vrot.slane %v610_v43, %v1134_v59  ;;  %v721_v58 = vrot.slane %v611_v44, %v1134_v59  ;;  %v644_v60 = vrot.slane %v613_v46, %v1128_v57 }
 0x20f   :  { %v658_v54 = vsel %vm657_vm3, %v632_v51, %v628_v50  ;;  %v648_v61 = vrot.slane %v614_v47, %v1128_v57  ;;  %v725_v63 = vrot.slane %v612_v45, %v1134_v59  ;;  %v652_v1 = vrot.slane %v615_v48, %v1128_v57 }
 0x210   :  { %v660_v14 = vsel %vm659_vm4, %v636_v52, %v658_v54  ;;  %v742_v0 = vsel %vm657_vm3, %v717_v56, %v713_v55  ;;  %v729_v3 = vrot.slane %v613_v46, %v1134_v59  ;;  %v656_v5 = vrot.slane %v616_v49, %v1128_v57 }
 0x211   :  { %v662_v62 = vsel %vm661_vm5, %v640_v53, %v660_v14  ;;  %v743_v4 = vsel %vm659_vm4, %v721_v58, %v742_v0  ;;  %v733_v7 = vrot.slane %v614_v47, %v1134_v59  ;;  %v737_v11 = vrot.slane %v615_v48, %v1134_v59 }
 0x212   :  { %v664_v2 = vsel %vm663_vm6, %v644_v60, %v662_v62  ;;  %v744_v8 = vsel %vm661_vm5, %v725_v63, %v743_v4  ;;  %v741_v13 = vrot.slane %v616_v49, %v1134_v59 }
 0x213   :  { %v666_v6 = vsel %vm665_vm7, %v648_v61, %v664_v2  ;;  %v745_v12 = vsel %vm663_vm6, %v729_v3, %v744_v8 }
 0x214   :  { %v668_v10 = vsel %vm667_vm8, %v652_v1, %v666_v6  ;;  %v746_v15 = vsel %vm665_vm7, %v733_v7, %v745_v12 }
 0x215   :  { %v670_v9 = vsel %vm669_vm9, %v656_v5, %v668_v10  ;;  %v747_v57 = vsel %vm667_vm8, %v737_v11, %v746_v15 }
 0x216   :  { %672 = vxpose.xlu0.b32.start.end [1/1] (short) (narrow) %v670_v9, 32  ;;  %v748_v16 = vsel %vm669_vm9, %v741_v13, %v747_v57 }
 0x223   :  { %750 = vxpose.xlu0.b32.start.end [1/1] (short) (narrow) %v748_v16, 32 }
 0x296   :  { %v688_v17 = vpop.trf.xlu0 }
 0x297   :  { %705 = vst.msk [vmem:[%s1221_s5] sm:$0xff] %vm704_vm10, %v688_v17 }
 0x29a   :  { %v689_v18 = vpop.trf.xlu0 }
 0x29b   :  { %706 = vst.msk [vmem:[%s1221_s5 + $0x8] sm:$0xff] %vm704_vm10, %v689_v18 }
 0x29e   :  { %v690_v59 = vpop.trf.xlu0 }
 0x29f   :  { %707 = vst.msk [vmem:[%s1221_s5 + $0x10] sm:$0xff] %vm704_vm10, %v690_v59 }
 0x2a2   :  { %v691_v19 = vpop.trf.xlu0 }
 0x2a3   :  { %709 = vst.msk [vmem:[%s1221_s5 + $0x18] sm:$0x3f] %vm708_vm11, %v691_v19 }
 0x2a6   :  { %v766_v20 = vpop.trf.xlu0 }
 0x2a7   :  { %824 = vst.msk [vmem:[%s1221_s5 + $0x20] sm:$0xff] %vm704_vm10, %v766_v20 }
 0x2aa   :  { %v767_v21 = vpop.trf.xlu0 }
 0x2ab   :  { %825 = vst.msk [vmem:[%s1221_s5 + $0x28] sm:$0xff] %vm704_vm10, %v767_v21 }
 0x2ae   :  { %v768_v22 = vpop.trf.xlu0 }
 0x2af   :  { %826 = vst.msk [vmem:[%s1221_s5 + $0x30] sm:$0xff] %vm704_vm10, %v768_v22 }
 0x2b2   :  { %v769_v23 = vpop.trf.xlu0 }
 0x2b3   :  { %827 = vst.msk [vmem:[%s1221_s5 + $0x38] sm:$0x3f] %vm708_vm11, %v769_v23 }

</bundles_post_ra>
